<compile_context>
chip_gen: v7x
topology: tpu7x:2x2x1
jax: 0.10.0
libtpu: 0.0.40
codegen_flags: <defaults>
</compile_context>

<pallas_src>
import functools

import jax
import jax.numpy as jnp
from jax import lax
from jax.experimental import pallas as pl
from jax.experimental.pallas import tpu as pltpu


def _round_up(x, m):
    return (x + m - 1) // m * m


def _cdiv(a, b):
    return (a + b - 1) // b


def _ce_label_smooth_kernel(logits_ref, targets_ref, out_ref, acc_ref, *,
                            epsilon, num_classes, n_total, tile_n,
                            tiles_per_split):
    step = pl.program_id(1)

    @pl.when(step == 0)
    def _():
        acc_ref[...] = jnp.zeros_like(acc_ref)

    x = logits_ref[...].astype(jnp.float32)                 # (tile_n, C)
    tn, c = x.shape

    # Numerically stable log-softmax pieces (3 cross-lane reductions total).
    m = jnp.max(x, axis=1, keepdims=True)                   # reduce 1
    shifted = x - m
    lse = jnp.log(jnp.sum(jnp.exp(shifted), axis=1, keepdims=True))  # reduce 2

    # Smoothed-label weights: w = eps/C + (1-eps)*onehot(target); sum_c w == 1,
    # so row_loss = sum_c w*(lse - shifted_c) = lse - sum_c w*shifted_c.
    # NOTE: targets outside [0, C) contribute only the uniform smoothing term
    # (PyTorch's scatter_ would raise instead).
    tgt = targets_ref[...]                                   # (tile_n, 1) int32
    class_ids = lax.broadcasted_iota(jnp.int32, (tn, c), 1)
    eps = jnp.float32(epsilon)
    uni = eps / jnp.float32(num_classes)
    w = jnp.where(class_ids == tgt, (1.0 - eps) + uni, uni)
    weighted = jnp.sum(w * shifted, axis=1, keepdims=True)   # reduce 3
    row_loss = lse - weighted                                # (tile_n, 1)

    # Mask rows outside the real batch (partial last block and clamped split
    # tiles).  Must stay a select so garbage/NaN in padded rows cannot leak.
    tile_idx = pl.program_id(0) * tiles_per_split + step
    row_ids = tile_idx * tile_n + lax.broadcasted_iota(jnp.int32, (tn, 1), 0)
    row_loss = jnp.where(row_ids < n_total, row_loss, 0.0)

    acc_ref[...] += row_loss                                 # vector accumulator

    @pl.when(step == pl.num_programs(1) - 1)
    def _():
        # Single reduce-to-scalar per split; normalize by the global batch size
        # (compile-time reciprocal).  Fill the whole lane-dense block.
        partial = jnp.sum(acc_ref[...]) * jnp.float32(1.0 / n_total)
        out_ref[...] = jnp.zeros(out_ref.shape, jnp.float32) + partial


def cross_entropy_label_smooth(logits, targets, *, epsilon, tile_n=1024,
                               n_splits=2):
    """logits: (N, C) float32/bf16; targets: (N,) int class ids -> scalar loss."""
    n, c = logits.shape
    itemsize = jnp.dtype(logits.dtype).itemsize
    # Sub-32-bit dtypes pack rows along sublanes -> coarser row alignment.
    align = {4: 8, 2: 16, 1: 32}.get(itemsize, 8)

    # Per-row VMEM cost: double-buffered logits row + double-buffered
    # (lane-padded) int32 targets row + f32 accumulator row.
    row_bytes = 2 * c * itemsize + 2 * 128 * 4 + 128 * 4
    budget = 32 * 1024 * 1024
    tile_cap = max(align, (budget // row_bytes) // align * align)
    tile_n = max(align, _round_up(int(tile_n), align))
    tile_n = min(tile_n, tile_cap, _round_up(n, align))

    grid_n = _cdiv(n, tile_n)
    n_splits = max(1, min(int(n_splits), grid_n))
    tiles_per_split = _cdiv(grid_n, n_splits)

    targets_2d = targets.reshape(n, 1).astype(jnp.int32)

    kernel = functools.partial(
        _ce_label_smooth_kernel,
        epsilon=float(epsilon),
        num_classes=int(c),
        n_total=int(n),
        tile_n=int(tile_n),
        tiles_per_split=int(tiles_per_split),
    )

    # Clamp logical tile indices past the real grid; the in-kernel row mask
    # (computed from the UNclamped index) zeroes their contribution.
    def block_map(s, i):
        return (jnp.minimum(s * tiles_per_split + i, grid_n - 1), 0)

    vmem_need = (2 * tile_n * c * itemsize        # logits double buffer
                 + 2 * tile_n * 128 * 4           # targets double buffer (lane pad)
                 + tile_n * 128 * 4               # f32 accumulator
                 + 2 * 8 * 128 * 4                # output block buffers
                 + (2 << 20))                     # slack
    vmem_limit = int(min(max(vmem_need, 32 << 20), 48 << 20))

    cost = pl.CostEstimate(
        flops=5 * n * c,
        transcendentals=n * c + n,
        bytes_accessed=n * c * itemsize + n * 4 + n_splits * 8 * 128 * 4,
    )

    out = pl.pallas_call(
        kernel,
        out_shape=jax.ShapeDtypeStruct((n_splits, 8, 128), jnp.float32),
        grid=(n_splits, tiles_per_split),
        in_specs=[
            pl.BlockSpec((tile_n, c), block_map),   # logits tile (full-C block)
            pl.BlockSpec((tile_n, 1), block_map),   # target indices tile
            # TODO(synk): for tile_n >= 1024 consider a lane-dense (1, tile_n)
            # targets block (or SMEM scalar prefetch) to cut the 128x lane pad.
        ],
        out_specs=pl.BlockSpec((1, 8, 128), lambda s, i: (s, 0, 0)),
        scratch_shapes=[pltpu.VMEM((tile_n, 1), jnp.float32)],
        compiler_params=pltpu.CompilerParams(
            dimension_semantics=("parallel", "arbitrary"),
            vmem_limit_bytes=vmem_limit,
        ),
        cost_estimate=cost,
    )(logits, targets_2d)
    # TODO(synk): for vocab-scale C, add an "arbitrary" grid axis over C with an
    # online logsumexp so blocks stay (tile_n, tile_c); also worth sweeping
    # pipeline_mode=pl.Buffered(3) on the logits spec where VMEM headroom exists.
    return jnp.sum(out[:, 0, 0])


def _reference_loss(logits, targets, epsilon, num_classes):
    log_probs = jax.nn.log_softmax(logits.astype(jnp.float32), axis=1)
    one_hot = jax.nn.one_hot(targets, num_classes, dtype=jnp.float32)
    smooth = (1.0 - epsilon) * one_hot + epsilon / num_classes
    return jnp.sum(jnp.mean(-smooth * log_probs, axis=0))


if __name__ == "__main__":
    num_classes = 32
    epsilon = 0.1
    key = jax.random.PRNGKey(0)

    # Case 1: small batch, single tile, single split.
    batch = 8
    k_logits, k_targets, key = jax.random.split(key, 3)
    logits = jax.random.normal(k_logits, (batch, num_classes), dtype=jnp.float32)
    targets = jax.random.randint(k_targets, (batch,), 0, num_classes, dtype=jnp.int32)
    loss = cross_entropy_label_smooth(logits, targets, epsilon=epsilon)
    jax.block_until_ready(loss)
    ref = _reference_loss(logits, targets, epsilon, num_classes)
    assert jnp.allclose(loss, ref, atol=1e-5, rtol=1e-5), (loss, ref)

    # Case 2: non-multiple-of-8 batch (partial last block, no wrapper padding).
    batch = 13
    k_logits, k_targets, key = jax.random.split(key, 3)
    logits = jax.random.normal(k_logits, (batch, num_classes), dtype=jnp.float32)
    targets = jax.random.randint(k_targets, (batch,), 0, num_classes, dtype=jnp.int32)
    loss = cross_entropy_label_smooth(logits, targets, epsilon=epsilon)
    jax.block_until_ready(loss)
    ref = _reference_loss(logits, targets, epsilon, num_classes)
    assert jnp.allclose(loss, ref, atol=1e-5, rtol=1e-5), (loss, ref)

    # Case 3: multi-tile, 2-way split with an odd tile count (exercises the
    # clamped index_map + per-split partials), bf16 logits.
    batch = 40
    k_logits, k_targets, key = jax.random.split(key, 3)
    logits = jax.random.normal(k_logits, (batch, num_classes), dtype=jnp.bfloat16)
    targets = jax.random.randint(k_targets, (batch,), 0, num_classes, dtype=jnp.int32)
    loss = cross_entropy_label_smooth(logits, targets, epsilon=epsilon, tile_n=16)
    jax.block_until_ready(loss)
    ref = _reference_loss(logits, targets, epsilon, num_classes)
    assert jnp.allclose(loss, ref, atol=2e-2, rtol=2e-2), (loss, ref)

    print("KERNEL_OK")
</pallas_src>

<mosaic_0001>
module attributes {stable_mosaic.version = 11 : i64} {
  func.func @_ce_label_smooth_kernel(%arg0: i32, %arg1: i32, %arg2: memref<8x32xf32, #tpu.memory_space<vmem>>, %arg3: memref<8x1xi32, #tpu.memory_space<vmem>>, %arg4: memref<1x8x128xf32, #tpu.memory_space<vmem>>, %arg5: memref<8x1xf32, #tpu.memory_space<vmem>>) attributes {dimension_semantics = [#tpu.dimension_semantics<parallel>, #tpu.dimension_semantics<arbitrary>], iteration_bounds = array<i64: 1, 1>, scalar_prefetch = 0 : i64, scratch_operands = 1 : i64, tpu.core_type = #tpu.core_type<tc>, window_params = [{transform_indices = @transform_0, window_bounds = array<i64: 8, 32>}, {transform_indices = @transform_1, window_bounds = array<i64: 8, 1>}, {transform_indices = @transform_2, window_bounds = array<i64: 1, 8, 128>}]} {
    %c0_i32 = arith.constant 0 : i32
    %0 = arith.cmpi eq, %arg1, %c0_i32 : i32
    %1 = arith.extui %0 : i1 to i32
    %c0_i32_0 = arith.constant 0 : i32
    %2 = arith.cmpi ne, %1, %c0_i32_0 : i32
    scf.if %2 {
      %cst_18 = arith.constant 0.000000e+00 : f32
      %42 = vector.broadcast %cst_18 : f32 to vector<8x1xf32>
      %c0_19 = arith.constant 0 : index
      %c0_20 = arith.constant 0 : index
      %43 = vector.load %arg5[%c0_19, %c0_20] : memref<8x1xf32, #tpu.memory_space<vmem>>, vector<8x1xf32>
      tpu.vector_store %arg5[%c0_19, %c0_20], %42 {strides = array<i32>} : memref<8x1xf32, #tpu.memory_space<vmem>>, vector<8x1xf32>,
    } else {
    }
    %c0 = arith.constant 0 : index
    %c0_1 = arith.constant 0 : index
    %3 = vector.load %arg2[%c0, %c0_1] : memref<8x32xf32, #tpu.memory_space<vmem>>, vector<8x32xf32>
    %cst = arith.constant dense<0xFF800000> : vector<8xf32>
    %4 = vector.multi_reduction <maximumf>, %3, %cst [1] : vector<8x32xf32> to vector<8xf32>
    %5 = vector.shape_cast %4 : vector<8xf32> to vector<8x1xf32>
    %6 = vector.broadcast %5 : vector<8x1xf32> to vector<8x32xf32>
    %7 = arith.subf %3, %6 : vector<8x32xf32>
    %8 = math.exp %7 : vector<8x32xf32>
    %cst_2 = arith.constant dense<0.000000e+00> : vector<8xf32>
    %9 = vector.multi_reduction <add>, %8, %cst_2 [1] : vector<8x32xf32> to vector<8xf32>
    %10 = vector.shape_cast %9 : vector<8xf32> to vector<8x1xf32>
    %11 = math.log %10 : vector<8x1xf32>
    %c0_3 = arith.constant 0 : index
    %c0_4 = arith.constant 0 : index
    %12 = vector.load %arg3[%c0_3, %c0_4] : memref<8x1xi32, #tpu.memory_space<vmem>>, vector<8x1xi32>
    %13 = tpu.iota {dimensions = array<i32: 1>} : vector<8x32xi32>
    %cst_5 = arith.constant 1.000000e-01 : f32
    %cst_6 = arith.constant 3.200000e+01 : f32
    %14 = arith.divf %cst_5, %cst_6 : f32
    %15 = vector.broadcast %12 : vector<8x1xi32> to vector<8x32xi32>
    %16 = arith.cmpi eq, %13, %15 : vector<8x32xi32>
    %cst_7 = arith.constant 1.000000e+00 : f32
    %cst_8 = arith.constant 1.000000e-01 : f32
    %17 = arith.subf %cst_7, %cst_8 : f32
    %18 = arith.addf %17, %14 : f32
    %19 = vector.broadcast %18 : f32 to vector<8x32xf32>
    %20 = vector.broadcast %14 : f32 to vector<8x32xf32>
    %21 = arith.select %16, %19, %20 : vector<8x32xi1>, vector<8x32xf32>
    %22 = arith.mulf %21, %7 : vector<8x32xf32>
    %cst_9 = arith.constant dense<0.000000e+00> : vector<8xf32>
    %23 = vector.multi_reduction <add>, %22, %cst_9 [1] : vector<8x32xf32> to vector<8xf32>
    %24 = vector.shape_cast %23 : vector<8xf32> to vector<8x1xf32>
    %25 = arith.subf %11, %24 : vector<8x1xf32>
    %c1_i32 = arith.constant 1 : i32
    %26 = arith.muli %arg0, %c1_i32 : i32
    %27 = arith.addi %26, %arg1 : i32
    %c8_i32 = arith.constant 8 : i32
    %28 = arith.muli %27, %c8_i32 : i32
    %29 = tpu.iota {dimensions = array<i32: 0>} : vector<8x1xi32>
    %30 = vector.broadcast %28 : i32 to vector<8x1xi32>
    %31 = arith.addi %30, %29 : vector<8x1xi32>
    %c8_i32_10 = arith.constant 8 : i32
    %32 = vector.broadcast %c8_i32_10 : i32 to vector<8x1xi32>
    %33 = arith.cmpi slt, %31, %32 : vector<8x1xi32>
    %cst_11 = arith.constant 0.000000e+00 : f32
    %34 = vector.broadcast %cst_11 : f32 to vector<8x1xf32>
    %35 = arith.select %33, %25, %34 : vector<8x1xi1>, vector<8x1xf32>
    %c0_12 = arith.constant 0 : index
    %c0_13 = arith.constant 0 : index
    %36 = vector.load %arg5[%c0_12, %c0_13] : memref<8x1xf32, #tpu.memory_space<vmem>>, vector<8x1xf32>
    %37 = arith.addf %36, %35 : vector<8x1xf32>
    %c0_14 = arith.constant 0 : index
    %c0_15 = arith.constant 0 : index
    %38 = vector.load %arg5[%c0_14, %c0_15] : memref<8x1xf32, #tpu.memory_space<vmem>>, vector<8x1xf32>
    tpu.vector_store %arg5[%c0_14, %c0_15], %37 {strides = array<i32>} : memref<8x1xf32, #tpu.memory_space<vmem>>, vector<8x1xf32>,
    %c0_i32_16 = arith.constant 0 : i32
    %39 = arith.cmpi eq, %arg1, %c0_i32_16 : i32
    %40 = arith.extui %39 : i1 to i32
    %c0_i32_17 = arith.constant 0 : i32
    %41 = arith.cmpi ne, %40, %c0_i32_17 : i32
    scf.if %41 {
      %c0_18 = arith.constant 0 : index
      %c0_19 = arith.constant 0 : index
      %42 = vector.load %arg5[%c0_18, %c0_19] : memref<8x1xf32, #tpu.memory_space<vmem>>, vector<8x1xf32>
      %43 = vector.shape_cast %42 : vector<8x1xf32> to vector<1x8x1xf32>
      %cst_20 = arith.constant dense<0.000000e+00> : vector<1xf32>
      %44 = vector.multi_reduction <add>, %43, %cst_20 [1, 2] : vector<1x8x1xf32> to vector<1xf32>
      %45 = vector.shape_cast %44 : vector<1xf32> to vector<1x1x1xf32>
      %46 = vector.extract %45[0, 0, 0] : f32 from vector<1x1x1xf32>
      %cst_21 = arith.constant 1.250000e-01 : f32
      %47 = arith.mulf %46, %cst_21 : f32
      %cst_22 = arith.constant 0.000000e+00 : f32
      %48 = vector.broadcast %cst_22 : f32 to vector<1x8x128xf32>
      %49 = vector.broadcast %47 : f32 to vector<1x8x128xf32>
      %50 = arith.addf %48, %49 : vector<1x8x128xf32>
      %c0_23 = arith.constant 0 : index
      %c0_24 = arith.constant 0 : index
      %c0_25 = arith.constant 0 : index
      %51 = vector.load %arg4[%c0_23, %c0_24, %c0_25] : memref<1x8x128xf32, #tpu.memory_space<vmem>>, vector<1x8x128xf32>
      tpu.vector_store %arg4[%c0_23, %c0_24, %c0_25], %50 {strides = array<i32>} : memref<1x8x128xf32, #tpu.memory_space<vmem>>, vector<1x8x128xf32>,
    } else {
    }
    return
  }
  func.func @transform_0(%arg0: i32, %arg1: i32) -> (i32, i32) {
    %c1_i32 = arith.constant 1 : i32
    %0 = arith.muli %arg0, %c1_i32 : i32
    %1 = arith.addi %0, %arg1 : i32
    %c0_i32 = arith.constant 0 : i32
    %2 = arith.minsi %1, %c0_i32 : i32
    %c0_i32_0 = arith.constant 0 : i32
    %c0_i32_1 = arith.constant 0 : i32
    return %2, %c0_i32_0 : i32, i32
  }
  func.func @transform_1(%arg0: i32, %arg1: i32) -> (i32, i32) {
    %c1_i32 = arith.constant 1 : i32
    %0 = arith.muli %arg0, %c1_i32 : i32
    %1 = arith.addi %0, %arg1 : i32
    %c0_i32 = arith.constant 0 : i32
    %2 = arith.minsi %1, %c0_i32 : i32
    %c0_i32_0 = arith.constant 0 : i32
    %c0_i32_1 = arith.constant 0 : i32
    return %2, %c0_i32_0 : i32, i32
  }
  func.func @transform_2(%arg0: i32, %arg1: i32) -> (i32, i32, i32) {
    %c0_i32 = arith.constant 0 : i32
    %c0_i32_0 = arith.constant 0 : i32
    %c0_i32_1 = arith.constant 0 : i32
    return %arg0, %c0_i32, %c0_i32_0 : i32, i32, i32
  }
}

</mosaic_0001>

<bundles_post_ra>
// kernel: tpu_custom_call.1
= control target key start
LH: loop header
LB: loop body
LE: loop exit
PB: predicated region body
PF: predicated region fallthrough
CT: control target
= control target key end

     0   :  { %vm73_vm0 = vcmask 261120   ;;  %s229_s0 = inlined_call_operand.vmem [shape: f32[8,32], index: 0, kind: input, shape index: {}]   ;;  %s230_s1 = inlined_call_operand.vmem [shape: s32[8,1], index: 1, kind: input, shape index: {}]   ;;  %s231_s2 = inlined_call_operand.hbm [shape: f32[1,8,128], index: 2, kind: output, shape index: {}]  }
   0x1   :  { %v72_v0 = vld [vmem:[%s229_s0] sm:$0xff] }
   0x2   :  { %7 = vsyncpa [#allocation4], 0  ;;  %v74_v1 = vsel %vm73_vm0, %v72_v0, -inf  ;;  %v189_v2 = vmov 0   ;;  %v85_v3 = vld [vmem:[%s230_s1] sm:$0xff]  ;;  %v86_v6 = vlaneseq  ;;  %vm70_vm2 = vcmask 7168  }
   0x3   :  { %160 = vset.pattern.permute.xlu0 %v189_v2  ;;  %v190_v10 = vmov 0.003125   ;;  %v191_v16 = vmov 0.0   ;;  %s192_s0 = smov [#allocation3]  }
   0x4   :  { %75 = vmax.xlane.f32.xlu0 %v74_v1  ;;  %v87_v8 = vand.u32 127, %v86_v6  ;;  %71 = vst.msk [vmem:[#allocation2] sm:$0xff] %vm70_vm2, %v191_v16  ;;  %s134_s1 = sshll.u32 %s192_s0, 4  ;;  %s135_s1 = int_to_ptr.vmem [resolvable:$true] %s134_s1 }
   0x5   :  { %s165_s15 = scalar_lea.vmem %s135_s1, 128  ;;  %p170_p1 = scmp.lt.s32.totalorder %s135_s1, %s135_s1 }
   0x6   :  { %p166_p0 = scmp.ne.s32.totalorder %s135_s1, %s165_s15  ;;  %p171_p2 = scmp.lt.s32.totalorder %s165_s15, %s165_s15 }
   0x8   :  { %p172_p3 = por %p171_p2, %p170_p1 }
   0xa   :  { %p173_p4 = pnand %p172_p3, %p166_p0 }
   0xb   :  { %v106_v21 = vld [vmem:[#allocation2] sm:$0xff] }
  0x1a   :  { %89 = vperm.xlu0 %160, %v85_v3  }
  0x91   :  { %v76_v4 = vpop.xlane.xlu0 %75 }
  0x92   :  { %v77_v5 = vsub.f32 %v72_v0, %v76_v4 }
  0x94   :  { %v78_v7 = vmul.f32 1.442695, %v77_v5 }
  0x96   :  { %161 = vpow2.f32 %v78_v7 }
  0x99   :  { %v90_v9 = vpop.permute.xlu0 %89 }
  0x9a   :  { %vm91_vm1 = vcmp.eq.s32.totalorder %v87_v8, %v90_v9 }
  0x9b   :  { %v92_v11 = vsel %vm91_vm1, 0.903125, %v190_v10 }
  0x9c   :  { %v93_v14 = vmul.f32 %v92_v11, %v77_v5 }
  0x9e   :  { %v94_v15 = vsel %vm73_vm0, %v93_v14, 0.0 }
  0xa0   :  { %v162_v12 = vpop.eup %161 }
  0xa1   :  { %v80_v13 = vsel %vm73_vm0, %v162_v12, 0.0 }
  0xa2   :  { %81 = vadd.xlane.f32.xlu1 %v80_v13 }
  0xa6   :  { %95 = vadd.xlane.f32.xlu1 %v94_v15 }
 0x12f   :  { %v82_v17 = vpop.xlane.xlu1 %81 }
 0x130   :  { %163 = vlog2.f32 %v82_v17 }
 0x133   :  { %v96_v20 = vpop.xlane.xlu1 %95 }
 0x13a   :  { %v164_v18 = vpop.eup %163 }
 0x13b   :  { %v84_v19 = vmul.f32 0.6931472, %v164_v18 }
 0x13d   :  { %v97_v22 = vsub.f32 %v84_v19, %v96_v20 }
 0x13f   :  { %v107_v23 = vadd.f32 %v106_v21, %v97_v22 }
 0x141   :  { %109 = vst.msk [vmem:[#allocation2] sm:$0xff] %vm70_vm2, %v107_v23 }
 0x148   :  { %v113_v24 = vld [vmem:[#allocation2] sm:$0xff] }
 0x149   :  { %v114_v25 = vsel %vm70_vm2, %v113_v24, 0.0 }
 0x14a   :  { %115 = vadd.xlane.f32.xlu1 %v114_v25 }
 0x1d7   :  { %v116_v26 = vpop.xlane.xlu1 %115 }
 0x1d8   :  { %v117_v27 = vrot.slane %v116_v26, 4 }
 0x1da   :  { %v118_v28 = vadd.f32 %v117_v27, %v116_v26 }
 0x1dc   :  { %v119_v29 = vrot.slane %v118_v28, 2 }
 0x1de   :  { %v120_v30 = vadd.f32 %v119_v29, %v118_v28 }
 0x1e0   :  { %v121_v31 = vrot.slane %v120_v30, 1 }
 0x1e2   :  { %v122_v32 = vadd.f32 %v121_v31, %v120_v30 }
 0x1e4   :  { %154 = vpush %v122_v32 }
 0x215   :  { %s155_s13 = spop %154 }
 0x216   :  { %s124_s14 = smul.f32 0.125, %s155_s13 }
 0x218   :  { %v125_v33 = vstv %s124_s14 }
 0x219   :  { %127 = vst [vmem:[#allocation3] sm:$0xff] %v125_v33 }
 0x21a   :  { %176 = shalt.err (!%p173_p4)
}
 0x21b   :  { %s177_s18 = scalar_lea.hbm %s231_s2, 128 }
 0x21c   :  { %p178_p5 = scmp.ne.s32.totalorder %s231_s2, %s177_s18  ;;  %p181_p6 = scmp.lt.u32.totalorder %s177_s18, %s231_s2 }
 0x21e   :  { %p183_p7 = pnand %p181_p6, %p178_p5 }
 0x220   :  { %186 = shalt.err (!%p183_p7)
}
 0x221   :  { %137 = dma.vmem_to_hbm [thread:$0]  %s135_s1, 128, %s231_s2, [#allocation4]  }
 0x222   :  { %187 = dma.done.wait [#allocation4], 128  }
 0x223   :  { %188 = vsyncadd [#allocation4], 4294967168 }
 0x224   :  { %141 = vsyncpa [#allocation4], 1 }

</bundles_post_ra>
